<compile_context>
chip_gen: v5e
topology: v5e:2x2
jax: 0.10.0
libtpu: 0.0.40
codegen_flags: <defaults>
</compile_context>

<pallas_src>
import jax
import jax.numpy as jnp
from jax.experimental import pallas as pl
from jax.experimental.pallas import tpu as pltpu


def mlp_kernel(x_ref, w1_ref, b1_ref, w2_ref, b2_ref, o_ref):
    """Fused conv(as one matmul) + bias + ReLU + linear head, per batch tile.

    x_ref:  [TB, 256] f32   flattened NCHW input tile (read straight from HBM)
    w1_ref: [256, 32] f32   expanded conv weight (col = c*4 + oh*2 + ow)
    b1_ref: [1, 32]   f32   conv bias repeated over the 4 output positions
    w2_ref: [1, 32]   f32   linear weight (PyTorch Flatten order)
    b2_ref: [1, 1]    f32   linear bias
    o_ref:  [TB, 1]   f32
    """
    h = jnp.dot(x_ref[...], w1_ref[...], preferred_element_type=jnp.float32)
    h = jnp.maximum(h + b1_ref[...], 0.0)                      # bias + ReLU
    # Head: cross-lane reduce rides the XLU slot (ample slack; kernel is HBM-bound).
    o_ref[...] = jnp.sum(h * w2_ref[...], axis=-1, keepdims=True) + b2_ref[...]


def _expand_conv_weight(conv_w, H, W, OH, OW):
    """conv_w [C_out, C_in, k, k] -> W_exp [C_in*H*W, C_out*OH*OW] (f32).

    W_exp[ci*H*W + h*W + w, c*OH*OW + oh*OW + ow] = conv_w[c, ci, h-oh, w-ow]
    (0 outside the kernel window), so x.reshape(B, C_in*H*W) @ W_exp reproduces
    the VALID conv followed by PyTorch Flatten.
    """
    c_out, c_in, k, _ = conv_w.shape
    w_t = conv_w.transpose(1, 2, 3, 0).astype(jnp.float32)      # [ci, kh, kw, c]
    w6 = jnp.zeros((c_in, H, W, c_out, OH, OW), jnp.float32)
    for oh in range(OH):
        for ow in range(OW):
            w6 = w6.at[:, oh:oh + k, ow:ow + k, :, oh, ow].set(w_t)
    return w6.reshape(c_in * H * W, c_out * OH * OW)


def prepare_params(conv_w, conv_b, lin_w, lin_b, H=4, W=4):
    """One-time parameter plumbing (keep OUT of the per-step forward)."""
    k = conv_w.shape[-1]                      # 3
    OH, OW = H - k + 1, W - k + 1             # 2, 2
    F = conv_w.shape[0] * OH * OW             # 32
    w1 = _expand_conv_weight(conv_w, H, W, OH, OW)                       # [256, 32]
    b1 = jnp.repeat(conv_b.astype(jnp.float32), OH * OW).reshape(1, F)   # [1, 32]
    w2 = lin_w.reshape(1, F).astype(jnp.float32)                         # [1, 32]
    b2 = lin_b.reshape(1, 1).astype(jnp.float32)                         # [1, 1]
    return w1, b1, w2, b2


def _pick_batch_tile(B):
    """Big tiles to amortize the ~0.35us per-grid-step overhead, but keep
    >= 2 grid steps once B is non-trivial so the parallel axis can split
    across v7x's two TensorCores.  Capped at 8192 rows (~24 MiB VMEM with
    double-buffering, within the explicit vmem limit below)."""
    if B <= 1024:
        return B
    half = (B + 1) // 2
    return min(8192, ((half + 127) // 128) * 128)


@jax.jit
def mlp_forward(x, w1, b1, w2, b2):
    """x: [B, 16, 4, 4] NCHW float32. Returns [B] (matches PyTorch .reshape(-1))."""
    B = x.shape[0]
    K, F = w1.shape                           # 256, 32

    # Free metadata reshape; NO dtype cast here (kernel reads f32 directly).
    x_flat = x.reshape(B, K)

    TB = _pick_batch_tile(B)
    grid = (pl.cdiv(B, TB),)

    cost = pl.CostEstimate(
        flops=2 * B * K * F,
        transcendentals=0,
        bytes_accessed=B * K * 4 + K * F * 4 + B * 4,
    )

    out = pl.pallas_call(
        mlp_kernel,
        out_shape=jax.ShapeDtypeStruct((B, 1), jnp.float32),
        grid_spec=pltpu.PrefetchScalarGridSpec(
            num_scalar_prefetch=0,
            grid=grid,
            in_specs=[
                pl.BlockSpec((TB, K), lambda i: (i, 0)),   # x tile (pipelined)
                pl.BlockSpec((K, F), lambda i: (0, 0)),    # W_exp (VMEM-resident)
                pl.BlockSpec((1, F), lambda i: (0, 0)),    # conv bias
                pl.BlockSpec((1, F), lambda i: (0, 0)),    # linear weight
                pl.BlockSpec((1, 1), lambda i: (0, 0)),    # linear bias
            ],
            out_specs=pl.BlockSpec((TB, 1), lambda i: (i, 0)),
        ),
        compiler_params=pltpu.CompilerParams(
            dimension_semantics=("parallel",),
            vmem_limit_bytes=40 << 20,
        ),
        cost_estimate=cost,
    )(x_flat, w1, b1, w2, b2)
    return out.reshape(-1)


def _reference(x, conv_w, conv_b, lin_w, lin_b):
    """Pure-JAX f32 reference matching the PyTorch forward."""
    y = jax.lax.conv_general_dilated(
        x, conv_w, window_strides=(1, 1), padding="VALID",
        dimension_numbers=("NCHW", "OIHW", "NCHW"))
    y = y + conv_b.reshape(1, -1, 1, 1)
    y = jnp.maximum(y, 0.0)
    y = y.reshape(y.shape[0], -1)                 # Flatten, order (c, oh, ow)
    y = y @ lin_w.T + lin_b                       # Linear(32, 1)
    return y.reshape(-1)


if __name__ == "__main__":
    key = jax.random.PRNGKey(0)
    k_x, k_w1, k_b1, k_w2, k_b2 = jax.random.split(key, 5)

    B = 2
    # shape=10 => conv kernel_size=3; input spatial 4x4 so conv output is 2x2.
    x = jax.random.normal(k_x, (B, 16, 4, 4), dtype=jnp.float32)

    # Parameter shapes from nn.Conv2d(16, 8, 3) / nn.Linear(32, 1).
    conv_w = 0.1 * jax.random.normal(k_w1, (8, 16, 3, 3), dtype=jnp.float32)
    conv_b = 0.1 * jax.random.normal(k_b1, (8,), dtype=jnp.float32)
    lin_w = 0.1 * jax.random.normal(k_w2, (1, 32), dtype=jnp.float32)
    lin_b = 0.1 * jax.random.normal(k_b2, (1,), dtype=jnp.float32)

    params = prepare_params(conv_w, conv_b, lin_w, lin_b, H=4, W=4)
    out = mlp_forward(x, *params)
    out = jax.block_until_ready(out)

    ref = _reference(x, conv_w, conv_b, lin_w, lin_b)
    assert out.shape == (B,), out.shape
    # Pure f32 path end-to-end now -> tight tolerance vs the f32 reference.
    assert jnp.allclose(out, ref, atol=1e-3, rtol=1e-3), (out, ref)

    print("KERNEL_OK")
</pallas_src>

<mosaic_0001>
module attributes {stable_mosaic.version = 11 : i64} {
  func.func @mlp_kernel(%arg0: i32, %arg1: memref<2x256xf32, #tpu.memory_space<vmem>>, %arg2: memref<256x32xf32, #tpu.memory_space<vmem>>, %arg3: memref<1x32xf32, #tpu.memory_space<vmem>>, %arg4: memref<1x32xf32, #tpu.memory_space<vmem>>, %arg5: memref<1x1xf32, #tpu.memory_space<vmem>>, %arg6: memref<2x1xf32, #tpu.memory_space<vmem>>) attributes {dimension_semantics = [#tpu.dimension_semantics<parallel>], iteration_bounds = array<i64: 1>, scalar_prefetch = 0 : i64, scratch_operands = 0 : i64, tpu.core_type = #tpu.core_type<tc>, window_params = [{transform_indices = @transform_0, window_bounds = array<i64: 2, 256>}, {pipeline_mode = #tpu.pipeline_mode<synchronous>, transform_indices = @transform_1, window_bounds = array<i64: 256, 32>}, {pipeline_mode = #tpu.pipeline_mode<synchronous>, transform_indices = @transform_2, window_bounds = array<i64: 1, 32>}, {pipeline_mode = #tpu.pipeline_mode<synchronous>, transform_indices = @transform_3, window_bounds = array<i64: 1, 32>}, {pipeline_mode = #tpu.pipeline_mode<synchronous>, transform_indices = @transform_4, window_bounds = array<i64: 1, 1>}, {transform_indices = @transform_5, window_bounds = array<i64: 2, 1>}]} {
    %c0 = arith.constant 0 : index
    %c0_0 = arith.constant 0 : index
    %0 = vector.load %arg1[%c0, %c0_0] : memref<2x256xf32, #tpu.memory_space<vmem>>, vector<2x256xf32>
    %c0_1 = arith.constant 0 : index
    %c0_2 = arith.constant 0 : index
    %1 = vector.load %arg2[%c0_1, %c0_2] : memref<256x32xf32, #tpu.memory_space<vmem>>, vector<256x32xf32>
    %cst = arith.constant dense<0.000000e+00> : vector<2x32xf32>
    %2 = tpu.matmul %0, %1, %cst {dimension_numbers = #tpu.dot_dimension_numbers<[1], [0], [0], [1], [0, 0, 1, 1], [], []>} : vector<2x256xf32>, vector<256x32xf32>, vector<2x32xf32> -> vector<2x32xf32>
    %c0_3 = arith.constant 0 : index
    %c0_4 = arith.constant 0 : index
    %3 = vector.load %arg3[%c0_3, %c0_4] : memref<1x32xf32, #tpu.memory_space<vmem>>, vector<1x32xf32>
    %4 = vector.broadcast %3 : vector<1x32xf32> to vector<2x32xf32>
    %5 = arith.addf %2, %4 : vector<2x32xf32>
    %cst_5 = arith.constant 0.000000e+00 : f32
    %6 = vector.broadcast %cst_5 : f32 to vector<2x32xf32>
    %7 = arith.maximumf %5, %6 : vector<2x32xf32>
    %c0_6 = arith.constant 0 : index
    %c0_7 = arith.constant 0 : index
    %8 = vector.load %arg4[%c0_6, %c0_7] : memref<1x32xf32, #tpu.memory_space<vmem>>, vector<1x32xf32>
    %9 = vector.broadcast %8 : vector<1x32xf32> to vector<2x32xf32>
    %10 = arith.mulf %7, %9 : vector<2x32xf32>
    %cst_8 = arith.constant dense<0.000000e+00> : vector<2xf32>
    %11 = vector.multi_reduction <add>, %10, %cst_8 [1] : vector<2x32xf32> to vector<2xf32>
    %12 = vector.shape_cast %11 : vector<2xf32> to vector<2x1xf32>
    %c0_9 = arith.constant 0 : index
    %c0_10 = arith.constant 0 : index
    %13 = vector.load %arg5[%c0_9, %c0_10] : memref<1x1xf32, #tpu.memory_space<vmem>>, vector<1x1xf32>
    %14 = vector.broadcast %13 : vector<1x1xf32> to vector<2x1xf32>
    %15 = arith.addf %12, %14 : vector<2x1xf32>
    %c0_11 = arith.constant 0 : index
    %c0_12 = arith.constant 0 : index
    %16 = vector.load %arg6[%c0_11, %c0_12] : memref<2x1xf32, #tpu.memory_space<vmem>>, vector<2x1xf32>
    tpu.vector_store %arg6[%c0_11, %c0_12], %15 {strides = array<i32>} : memref<2x1xf32, #tpu.memory_space<vmem>>, vector<2x1xf32>,
    return
  }
  func.func @transform_0(%arg0: i32) -> (i32, i32) {
    %c0_i32 = arith.constant 0 : i32
    %c0_i32_0 = arith.constant 0 : i32
    return %arg0, %c0_i32 : i32, i32
  }
  func.func @transform_1(%arg0: i32) -> (i32, i32) {
    %c0_i32 = arith.constant 0 : i32
    %c0_i32_0 = arith.constant 0 : i32
    %c0_i32_1 = arith.constant 0 : i32
    return %c0_i32, %c0_i32_0 : i32, i32
  }
  func.func @transform_2(%arg0: i32) -> (i32, i32) {
    %c0_i32 = arith.constant 0 : i32
    %c0_i32_0 = arith.constant 0 : i32
    %c0_i32_1 = arith.constant 0 : i32
    return %c0_i32, %c0_i32_0 : i32, i32
  }
  func.func @transform_3(%arg0: i32) -> (i32, i32) {
    %c0_i32 = arith.constant 0 : i32
    %c0_i32_0 = arith.constant 0 : i32
    %c0_i32_1 = arith.constant 0 : i32
    return %c0_i32, %c0_i32_0 : i32, i32
  }
  func.func @transform_4(%arg0: i32) -> (i32, i32) {
    %c0_i32 = arith.constant 0 : i32
    %c0_i32_0 = arith.constant 0 : i32
    %c0_i32_1 = arith.constant 0 : i32
    return %c0_i32, %c0_i32_0 : i32, i32
  }
  func.func @transform_5(%arg0: i32) -> (i32, i32) {
    %c0_i32 = arith.constant 0 : i32
    %c0_i32_0 = arith.constant 0 : i32
    return %arg0, %c0_i32 : i32, i32
  }
}

</mosaic_0001>

<bundles_post_ra>
// kernel: mlp_forward.1
= control target key start
LH: loop header
LB: loop body
LE: loop exit
PB: predicated region body
PF: predicated region fallthrough
CT: control target
= control target key end

     0   :  { %vm111_vm0 = vcmask 254976   ;;  %vm120_vm1 = vcmask 1024   ;;  %s270_s1 = inlined_call_operand.vmem [shape: f32[256,32], index: 1, kind: input, shape index: {}]   ;;  %s271_s0 = inlined_call_operand.vmem [shape: f32[2,256], index: 0, kind: input, shape index: {}]   ;;  %s272_s2 = inlined_call_operand.vmem [shape: f32[1,32], index: 2, kind: input, shape index: {}]   ;;  %s273_s3 = inlined_call_operand.vmem [shape: f32[1,32], index: 3, kind: input, shape index: {}]   ;;  %s274_s4 = inlined_call_operand.<no memory space> [shape: f32[1,1], index: 4, kind: input, shape index: {}]   ;;  %s275_s5 = inlined_call_operand.vmem [shape: f32[2,1], index: 5, kind: output, shape index: {}]  }
   0x1   :  { %v38_v0 = vld [vmem:[%s270_s1 + $0x78] sm:$0xff]  ;;  %v37_v1 = vld [vmem:[%s270_s1 + $0x70] sm:$0xff]  ;;  %v36_v4 = vld [vmem:[%s270_s1 + $0x68] sm:$0xff]  ;;  %v10_v35 = vstv %s274_s4 }
   0x2   :  { %v54_v2 = vld [vmem:[%s270_s1 + $0xf8] sm:$0xff]  ;;  %65 = vmatpush.msra.mxu0 %v38_v0  ;;  %v53_v3 = vld [vmem:[%s270_s1 + $0xf0] sm:$0xff]  ;;  %v52_v5 = vld [vmem:[%s270_s1 + $0xe8] sm:$0xff]  ;;  %11 = vst [vmem:[#allocation2] sm:$0x1] %v10_v35 }
   0x3   :  { %85 = vmatpush.msra.mxu1 %v54_v2  ;;  %v35_v6 = vld [vmem:[%s270_s1 + $0x60] sm:$0xff]  ;;  %v34_v8 = vld [vmem:[%s270_s1 + $0x58] sm:$0xff]  ;;  %v33_v10 = vld [vmem:[%s270_s1 + $0x50] sm:$0xff] }
   0x4   :  { %66 = vmatpush.msra.mxu0 %v37_v1  ;;  %v51_v7 = vld [vmem:[%s270_s1 + $0xe0] sm:$0xff]  ;;  %v50_v9 = vld [vmem:[%s270_s1 + $0xd8] sm:$0xff]  ;;  %v49_v11 = vld [vmem:[%s270_s1 + $0xd0] sm:$0xff] }
   0x5   :  { %86 = vmatpush.msra.mxu1 %v53_v3  ;;  %v32_v12 = vld [vmem:[%s270_s1 + $0x48] sm:$0xff]  ;;  %v22_v14 = vld [vmem:[%s271_s0] sm:$0xf]  ;;  %v30_v17 = vld [vmem:[%s270_s1 + $0x38] sm:$0xff] }
   0x6   :  { %67 = vmatpush.msra.mxu0 %v36_v4  ;;  %v48_v13 = vld [vmem:[%s270_s1 + $0xc8] sm:$0xff]  ;;  %60 = vst [vmem:[#allocation1] ss:$4 sm:$0xff] %v22_v14  ;;  %v31_v15 = vld [vmem:[%s270_s1 + $0x40] sm:$0xff]  ;;  %v46_v18 = vld [vmem:[%s270_s1 + $0xb8] sm:$0xff] }
   0x7   :  { %87 = vmatpush.msra.mxu1 %v52_v5  ;;  %v47_v16 = vld [vmem:[%s270_s1 + $0xc0] sm:$0xff]  ;;  %v29_v19 = vld [vmem:[%s270_s1 + $0x30] sm:$0xff]  ;;  %v28_v21 = vld [vmem:[%s270_s1 + $0x28] sm:$0xff] }
   0x8   :  { %68 = vmatpush.msra.mxu0 %v35_v6  ;;  %v45_v20 = vld [vmem:[%s270_s1 + $0xb0] sm:$0xff]  ;;  %v44_v22 = vld [vmem:[%s270_s1 + $0xa8] sm:$0xff]  ;;  %v27_v23 = vld [vmem:[%s270_s1 + $0x20] sm:$0xff] }
   0x9   :  { %88 = vmatpush.msra.mxu1 %v51_v7  ;;  %v43_v24 = vld [vmem:[%s270_s1 + $0xa0] sm:$0xff]  ;;  %v26_v25 = vld [vmem:[%s270_s1 + $0x18] sm:$0xff]  ;;  %v25_v27 = vld [vmem:[%s270_s1 + $0x10] sm:$0xff] }
   0xa   :  { %69 = vmatpush.msra.mxu0 %v34_v8  ;;  %v42_v26 = vld [vmem:[%s270_s1 + $0x98] sm:$0xff]  ;;  %v41_v28 = vld [vmem:[%s270_s1 + $0x90] sm:$0xff]  ;;  %v24_v29 = vld [vmem:[%s270_s1 + $0x8] sm:$0xff] }
   0xb   :  { %89 = vmatpush.msra.mxu1 %v50_v9  ;;  %v40_v30 = vld [vmem:[%s270_s1 + $0x88] sm:$0xff]  ;;  %v23_v31 = vld [vmem:[%s270_s1] sm:$0xff] }
   0xc   :  { %70 = vmatpush.msra.mxu0 %v33_v10  ;;  %v39_v32 = vld [vmem:[%s270_s1 + $0x80] sm:$0xff]  ;;  %v128_v45 = vld [vmem:[#allocation2] ss:$0 sm:$0xff] }
   0xd   :  { %90 = vmatpush.msra.mxu1 %v49_v11  ;;  %v61_v33 = vld.sshfl [vmem:[#allocation1] sm:$0xff pattern:$0x73625140]  ;;  %v62_v34 = vld.sshfl [vmem:[#allocation1 + $0x8] sm:$0xff pattern:$0x73625140] }
   0xe   :  { %71 = vmatpush.msra.mxu0 %v32_v12  ;;  %v126_v36 = vld [vmem:[%s272_s2] ss:$0 sm:$0xff] }
   0xf   :  { %91 = vmatpush.msra.mxu1 %v48_v13  ;;  %v127_v41 = vld [vmem:[%s273_s3] ss:$0 sm:$0xff] }
  0x10   :  { %72 = vmatpush.msra.mxu0 %v31_v15 }
  0x11   :  { %92 = vmatpush.msra.mxu1 %v47_v16 }
  0x12   :  { %73 = vmatpush.msra.mxu0 %v30_v17 }
  0x13   :  { %93 = vmatpush.msra.mxu1 %v46_v18 }
  0x14   :  { %74 = vmatpush.msra.mxu0 %v29_v19 }
  0x15   :  { %94 = vmatpush.msra.mxu1 %v45_v20 }
  0x16   :  { %75 = vmatpush.msra.mxu0 %v28_v21 }
  0x17   :  { %95 = vmatpush.msra.mxu1 %v44_v22 }
  0x18   :  { %76 = vmatpush.msra.mxu0 %v27_v23 }
  0x19   :  { %96 = vmatpush.msra.mxu1 %v43_v24 }
  0x1a   :  { %77 = vmatpush.msra.mxu0 %v26_v25 }
  0x1b   :  { %97 = vmatpush.msra.mxu1 %v42_v26 }
  0x1c   :  { %78 = vmatpush.msra.mxu0 %v25_v27 }
  0x1d   :  { %98 = vmatpush.msra.mxu1 %v41_v28 }
  0x1e   :  { %79 = vmatpush.msra.mxu0 %v24_v29 }
  0x1f   :  { %99 = vmatpush.msra.mxu1 %v40_v30 }
  0x20   :  { %80 = vmatpush.msra.mxu0 %v23_v31 }
  0x21   :  { %100 = vmatpush.msra.mxu1 %v39_v32  ;;  %81 = vmatmul.f32.vlgmr.msra.gmra.mxu0 %v61_v33 }
  0x22   :  { %101 = vmatmul.f32.vlgmr.msra.gmra.mxu1 %v62_v34 }
  0x9e   :  { %v82_v37 = vpop.f32.mrf.mxu0 }
  0x9f   :  { %v102_v38 = vpop.f32.mrf.mxu1  ;;  %v83_v39 = vadd.f32 %v126_v36, %v82_v37 }
  0xa1   :  { %v103_v40 = vadd.f32 %v102_v38, %v83_v39 }
  0xa3   :  { %v105_v42 = vmax.f32 %v103_v40, 0.0 }
  0xa5   :  { %v110_v43 = vmul.f32 %v127_v41, %v105_v42 }
  0xa7   :  { %v112_v44 = vsel %vm111_vm0, %v110_v43, 0.0 }
  0xa8   :  { %113 = vadd.xlane.f32.xlu0 %v112_v44 }
 0x11b   :  { %v114_v46 = vpop.xlane.xlu0 %113 }
 0x11c   :  { %v119_v47 = vadd.f32 %v128_v45, %v114_v46 }
 0x11e   :  { %121 = vst.msk [vmem:[%s275_s5] sm:$0x3] %vm120_vm1, %v119_v47 }

</bundles_post_ra>
